<compile_context>
chip_gen: v7x
topology: tpu7x:2x2x1
jax: 0.10.0
libtpu: 0.0.40
codegen_flags: <defaults>
</compile_context>

<pallas_src>
import functools
import math

import numpy as np

import jax
import jax.numpy as jnp
from jax import lax
from jax.experimental import pallas as pl
from jax.experimental.pallas import tpu as pltpu


def _corr2d_kernel(f1_ref, f2_ref, out_ref, *scratch, hw, tk, inv_sqrt_c):
    """One (batch, k-tile) grid step.

    f1_ref : (C, TK) VMEM tile of f1[b, :, k*TK:(k+1)*TK]
    f2_ref : (C, TK) VMEM tile of f2[b, :, k*TK:(k+1)*TK]
    out_ref: (C, C)  VMEM output block for batch b (resident across k)
    scratch: optional (C, C) f32 accumulator (only when out dtype != f32)
    """
    acc_ref = scratch[0] if scratch else out_ref
    k = pl.program_id(1)

    @pl.when(k == 0)
    def _():
        acc_ref[...] = jnp.zeros_like(acc_ref)

    a = f1_ref[...]
    b = f2_ref[...]

    # Mask the out-of-range lanes of the (possibly partial) last K block:
    # partial-block contents are unspecified and must not reach the MXU.
    if hw % tk != 0:
        idx = k * tk + lax.broadcasted_iota(jnp.int32, a.shape, 1)
        valid = idx < hw
        a = jnp.where(valid, a, jnp.zeros_like(a))
        b = jnp.where(valid, b, jnp.zeros_like(b))

    # Contract the last dim of both operands (== f1 @ f2^T) with no explicit
    # transpose; accumulate on the MXU in f32.
    acc_ref[...] += lax.dot_general(
        a, b,
        dimension_numbers=(((1,), (1,)), ((), ())),
        preferred_element_type=jnp.float32,
    )

    @pl.when(k == pl.num_programs(1) - 1)
    def _():
        out_ref[...] = (acc_ref[...] * inv_sqrt_c).astype(out_ref.dtype)


def _vmem_capacity_bytes():
    """Per-generation physical VMEM (v5e/v6e: 128 MiB, v7x: 64 MiB)."""
    try:
        return int(pltpu.get_tpu_info().vmem_capacity_bytes)
    except Exception:
        return 64 << 20  # conservative (v7x-sized) fallback


def _pick_tk(hw, c, itemsize, input_budget_bytes):
    """Largest lane-aligned K tile whose double-buffered input footprint
    (2 operands x 2 pipeline buffers x C x TK x itemsize) fits the budget."""
    if hw <= 128:
        return hw                          # full-extent block, no alignment rule
    hw_pad = pl.cdiv(hw, 128) * 128        # one block is enough to cover HW
    tk = input_budget_bytes // (4 * c * itemsize)
    tk = (tk // 128) * 128
    return int(max(128, min(tk, hw_pad)))


def corr2d(f1, f2):
    """Mirrors Corr2D().forward(f1, f2) for NCHW inputs; returns (N, C, C)."""
    n, c, h, w = f1.shape
    assert f2.shape == (n, c, h, w), (f1.shape, f2.shape)
    hw = h * w

    out_dtype = jnp.result_type(f1.dtype, f2.dtype)
    itemsize = np.dtype(out_dtype).itemsize
    inv_sqrt_c = 1.0 / math.sqrt(c)

    # Tiny C: (C, TK) tiles waste nearly all sublanes and the MXU; XLA's fused
    # einsum matches or beats a kernel launch there.
    if c <= 16:
        a = f1.reshape(n, c, hw).astype(out_dtype)
        b = f2.reshape(n, c, hw).astype(out_dtype)
        out = jnp.einsum("ncd,nkd->nck", a, b,
                         preferred_element_type=jnp.float32) * inv_sqrt_c
        return out.astype(out_dtype)

    # MXU wants matching operand dtypes; NCHW -> (N, C, HW) is a free view.
    f1 = f1.reshape(n, c, hw).astype(out_dtype)
    f2 = f2.reshape(n, c, hw).astype(out_dtype)

    out_is_f32 = np.dtype(out_dtype) == np.dtype(np.float32)
    scratch_shapes = [] if out_is_f32 else [pltpu.VMEM((c, c), jnp.float32)]
    out_footprint = 2 * c * c * itemsize + (0 if out_is_f32 else c * c * 4)

    # Generation-aware VMEM budget for the streamed, double-buffered inputs.
    vmem_cap = _vmem_capacity_bytes()
    input_budget = int(vmem_cap * 0.75) - out_footprint - (8 << 20)
    input_budget = max(input_budget, 4 * c * 128 * itemsize)
    tk = _pick_tk(hw, c, itemsize, input_budget)
    grid = (n, pl.cdiv(hw, tk))

    needed_vmem = 4 * c * tk * itemsize + out_footprint
    vmem_limit = int(min(vmem_cap * 0.9,
                         max(needed_vmem + (16 << 20), 32 << 20)))

    kernel = functools.partial(
        _corr2d_kernel, hw=hw, tk=tk, inv_sqrt_c=inv_sqrt_c)

    cost = pl.CostEstimate(
        flops=2 * n * c * c * hw,
        transcendentals=0,
        bytes_accessed=2 * n * c * hw * itemsize + n * c * c * itemsize,
    )

    return pl.pallas_call(
        kernel,
        out_shape=jax.ShapeDtypeStruct((n, c, c), out_dtype),
        grid_spec=pltpu.PrefetchScalarGridSpec(
            num_scalar_prefetch=0,
            grid=grid,
            in_specs=[
                pl.BlockSpec((None, c, tk), lambda b, k: (b, 0, k)),
                pl.BlockSpec((None, c, tk), lambda b, k: (b, 0, k)),
            ],
            out_specs=pl.BlockSpec((None, c, c), lambda b, k: (b, 0, 0)),
            scratch_shapes=scratch_shapes,
        ),
        compiler_params=pltpu.CompilerParams(
            dimension_semantics=("parallel", "arbitrary"),
            vmem_limit_bytes=vmem_limit,
        ),
        cost_estimate=cost,
    )(f1, f2)


def _reference_corr2d(f1, f2):
    """Pure-JAX reference matching the PyTorch module."""
    n, c, h, w = f1.shape
    a = f1.reshape(n, c, h * w).astype(jnp.float32)
    b = f2.reshape(n, c, h * w).astype(jnp.float32)
    out = jnp.einsum("ncd,nkd->nck", a, b,
                     precision=lax.Precision.HIGHEST,
                     preferred_element_type=jnp.float32)
    return out / math.sqrt(c)


if __name__ == "__main__":
    key = jax.random.PRNGKey(0)
    k1, k2 = jax.random.split(key)

    # Main test: exercises the Pallas kernel path (C > 16), HW multiple of 128.
    batch, channels, spatial = 2, 32, 16
    f1 = jax.random.normal(k1, (batch, channels, spatial, spatial), jnp.float32)
    f2 = jax.random.normal(k2, (batch, channels, spatial, spatial), jnp.float32)
    out = corr2d(f1, f2)
    jax.block_until_ready(out)
    ref = _reference_corr2d(f1, f2)
    assert out.shape == (batch, channels, channels), out.shape
    assert jnp.allclose(out, ref, atol=1e-3, rtol=1e-3)

    # Ragged HW (12*25 = 300, not a multiple of 128): masked partial K block.
    f1b = jax.random.normal(k1, (2, 32, 12, 25), jnp.float32)
    f2b = jax.random.normal(k2, (2, 32, 12, 25), jnp.float32)
    outb = corr2d(f1b, f2b)
    jax.block_until_ready(outb)
    assert jnp.allclose(outb, _reference_corr2d(f1b, f2b), atol=1e-3, rtol=1e-3)

    # bf16 inputs: exercises the (C, C) f32 scratch-accumulator path.
    outc = corr2d(f1.astype(jnp.bfloat16), f2.astype(jnp.bfloat16))
    jax.block_until_ready(outc)
    assert outc.dtype == jnp.bfloat16
    assert jnp.allclose(outc.astype(jnp.float32), ref, atol=0.5, rtol=5e-2)

    # Tiny-C dispatch (plain einsum fallback).
    f1d = jax.random.normal(k1, (2, 4, 16, 16), jnp.float32)
    f2d = jax.random.normal(k2, (2, 4, 16, 16), jnp.float32)
    outd = corr2d(f1d, f2d)
    jax.block_until_ready(outd)
    assert jnp.allclose(outd, _reference_corr2d(f1d, f2d), atol=1e-2, rtol=1e-2)

    print("KERNEL_OK")
</pallas_src>

<mosaic_0001>
module attributes {stable_mosaic.version = 11 : i64} {
  func.func @_corr2d_kernel(%arg0: i32, %arg1: i32, %arg2: memref<1x32x256xf32, #tpu.memory_space<vmem>>, %arg3: memref<1x32x256xf32, #tpu.memory_space<vmem>>, %arg4: memref<1x32x32xf32, #tpu.memory_space<vmem>>) attributes {dimension_semantics = [#tpu.dimension_semantics<parallel>, #tpu.dimension_semantics<arbitrary>], iteration_bounds = array<i64: 2, 1>, scalar_prefetch = 0 : i64, scratch_operands = 0 : i64, tpu.core_type = #tpu.core_type<tc>, window_params = [{transform_indices = @transform_0, window_bounds = array<i64: 1, 32, 256>}, {transform_indices = @transform_1, window_bounds = array<i64: 1, 32, 256>}, {transform_indices = @transform_2, window_bounds = array<i64: 1, 32, 32>}]} {
    %c0_i32 = arith.constant 0 : i32
    %0 = arith.cmpi eq, %arg1, %c0_i32 : i32
    %1 = arith.extui %0 : i1 to i32
    %c0_i32_0 = arith.constant 0 : i32
    %2 = arith.cmpi ne, %1, %c0_i32_0 : i32
    scf.if %2 {
      %cst_14 = arith.constant 0.000000e+00 : f32
      %17 = vector.broadcast %cst_14 : f32 to vector<32x32xf32>
      %c0_15 = arith.constant 0 : index
      %c0_16 = arith.constant 0 : index
      %c0_17 = arith.constant 0 : index
      %18 = vector.load %arg4[%c0_15, %c0_16, %c0_17] : memref<1x32x32xf32, #tpu.memory_space<vmem>>, vector<1x32x32xf32>
      %19 = vector.shape_cast %18 : vector<1x32x32xf32> to vector<32x32xf32>
      %20 = vector.shape_cast %17 : vector<32x32xf32> to vector<1x32x32xf32>
      tpu.vector_store %arg4[%c0_15, %c0_16, %c0_17], %20 {strides = array<i32>} : memref<1x32x32xf32, #tpu.memory_space<vmem>>, vector<1x32x32xf32>,
    } else {
    }
    %c0 = arith.constant 0 : index
    %c0_1 = arith.constant 0 : index
    %c0_2 = arith.constant 0 : index
    %3 = vector.load %arg2[%c0, %c0_1, %c0_2] : memref<1x32x256xf32, #tpu.memory_space<vmem>>, vector<1x32x256xf32>
    %4 = vector.shape_cast %3 : vector<1x32x256xf32> to vector<32x256xf32>
    %c0_3 = arith.constant 0 : index
    %c0_4 = arith.constant 0 : index
    %c0_5 = arith.constant 0 : index
    %5 = vector.load %arg3[%c0_3, %c0_4, %c0_5] : memref<1x32x256xf32, #tpu.memory_space<vmem>>, vector<1x32x256xf32>
    %6 = vector.shape_cast %5 : vector<1x32x256xf32> to vector<32x256xf32>
    %c0_6 = arith.constant 0 : index
    %c0_7 = arith.constant 0 : index
    %c0_8 = arith.constant 0 : index
    %7 = vector.load %arg4[%c0_6, %c0_7, %c0_8] : memref<1x32x32xf32, #tpu.memory_space<vmem>>, vector<1x32x32xf32>
    %8 = vector.shape_cast %7 : vector<1x32x32xf32> to vector<32x32xf32>
    %cst = arith.constant dense<0.000000e+00> : vector<32x32xf32>
    %9 = tpu.matmul %4, %6, %cst {dimension_numbers = #tpu.dot_dimension_numbers<[1], [1], [0], [0], [0, 0, 1, 0], [], []>} : vector<32x256xf32>, vector<32x256xf32>, vector<32x32xf32> -> vector<32x32xf32>
    %10 = arith.addf %8, %9 : vector<32x32xf32>
    %c0_9 = arith.constant 0 : index
    %c0_10 = arith.constant 0 : index
    %c0_11 = arith.constant 0 : index
    %11 = vector.load %arg4[%c0_9, %c0_10, %c0_11] : memref<1x32x32xf32, #tpu.memory_space<vmem>>, vector<1x32x32xf32>
    %12 = vector.shape_cast %11 : vector<1x32x32xf32> to vector<32x32xf32>
    %13 = vector.shape_cast %10 : vector<32x32xf32> to vector<1x32x32xf32>
    tpu.vector_store %arg4[%c0_9, %c0_10, %c0_11], %13 {strides = array<i32>} : memref<1x32x32xf32, #tpu.memory_space<vmem>>, vector<1x32x32xf32>,
    %c0_i32_12 = arith.constant 0 : i32
    %14 = arith.cmpi eq, %arg1, %c0_i32_12 : i32
    %15 = arith.extui %14 : i1 to i32
    %c0_i32_13 = arith.constant 0 : i32
    %16 = arith.cmpi ne, %15, %c0_i32_13 : i32
    scf.if %16 {
      %c0_14 = arith.constant 0 : index
      %c0_15 = arith.constant 0 : index
      %c0_16 = arith.constant 0 : index
      %17 = vector.load %arg4[%c0_14, %c0_15, %c0_16] : memref<1x32x32xf32, #tpu.memory_space<vmem>>, vector<1x32x32xf32>
      %18 = vector.shape_cast %17 : vector<1x32x32xf32> to vector<32x32xf32>
      %cst_17 = arith.constant 0.176776692 : f32
      %19 = vector.broadcast %cst_17 : f32 to vector<32x32xf32>
      %20 = arith.mulf %18, %19 : vector<32x32xf32>
      %c0_18 = arith.constant 0 : index
      %c0_19 = arith.constant 0 : index
      %c0_20 = arith.constant 0 : index
      %21 = vector.load %arg4[%c0_18, %c0_19, %c0_20] : memref<1x32x32xf32, #tpu.memory_space<vmem>>, vector<1x32x32xf32>
      %22 = vector.shape_cast %21 : vector<1x32x32xf32> to vector<32x32xf32>
      %23 = vector.shape_cast %20 : vector<32x32xf32> to vector<1x32x32xf32>
      tpu.vector_store %arg4[%c0_18, %c0_19, %c0_20], %23 {strides = array<i32>} : memref<1x32x32xf32, #tpu.memory_space<vmem>>, vector<1x32x32xf32>,
    } else {
    }
    return
  }
  func.func @transform_0(%arg0: i32, %arg1: i32) -> (i32, i32, i32) {
    %c0_i32 = arith.constant 0 : i32
    %c0_i32_0 = arith.constant 0 : i32
    return %arg0, %c0_i32, %arg1 : i32, i32, i32
  }
  func.func @transform_1(%arg0: i32, %arg1: i32) -> (i32, i32, i32) {
    %c0_i32 = arith.constant 0 : i32
    %c0_i32_0 = arith.constant 0 : i32
    return %arg0, %c0_i32, %arg1 : i32, i32, i32
  }
  func.func @transform_2(%arg0: i32, %arg1: i32) -> (i32, i32, i32) {
    %c0_i32 = arith.constant 0 : i32
    %c0_i32_0 = arith.constant 0 : i32
    %c0_i32_1 = arith.constant 0 : i32
    return %arg0, %c0_i32, %c0_i32_0 : i32, i32, i32
  }
}

</mosaic_0001>

<bundles_post_ra>
// kernel: tpu_custom_call.1
= control target key start
LH: loop header
LB: loop body
LE: loop exit
PB: predicated region body
PF: predicated region fallthrough
CT: control target
= control target key end

     0   :  { %7 = vsyncpa [#allocation3], 0  ;;  %s1045_s0 = inlined_call_operand.hbm [shape: f32[2,32,256], index: 0, kind: input, shape index: {}]   ;;  %s1046_s1 = inlined_call_operand.hbm [shape: f32[2,32,256], index: 1, kind: input, shape index: {}]   ;;  %s1047_s2 = inlined_call_operand.hbm [shape: f32[2,32,32], index: 2, kind: output, shape index: {}]  }
   0x1   :  { %9 = vsyncpa [#allocation3 + $0x1], 0 }
   0x2   :  { %10 = vsyncpa [#allocation6], 0 }
   0x3   :  { %12 = vsyncpa [#allocation6 + $0x1], 0 }
   0x4   :  { %13 = vsyncpa [#allocation4], 0 }
   0x5   :  { %15 = vsyncpa [#allocation4 + $0x1], 0  ;;  %s763_s9 = smov 0   ;;  %s765_s10 = smov 0  }
   0x6   :  { %s767_s11 = smov 0   ;;  %s769_s12 = smov 0  }
   0x7   :  { %s771_s13 = smov 0   ;;  %s773_s14 = smov 0  }
   0x8 LB: > { %s486_s15 = sadd.s32 4294967295, %s738_s14   ;;  %s487_s16 = sadd.s32 4294967294, %s738_s14   ;;  %s738_s14 = sphi %s773_s14, %s21_s14   ;;  %s734_s13 = sphi %s771_s13, %s1065_s13   ;;  %s730_s12 = sphi %s769_s12, %s1064_s12   ;;  %s726_s11 = sphi %s767_s11, %s1063_s11   ;;  %s722_s10 = sphi %s765_s10, %s1062_s10   ;;  %s718_s9 = sphi %s763_s9, %s1061_s9  }
   0x9   : > { %s33_s17 = sadd.s32 1, %s734_s13  ;;  %s42_s18 = sadd.s32 1, %s726_s11 }
   0xa   : > { %p35_p0 = scmp.ge.s32.totalorder %s33_s17, 2  ;;  %p49_p1 = scmp.ne.s32.totalorder %s726_s11, %s722_s10 }
   0xb   : > { %p50_p2 = scmp.eq.s32.totalorder %s738_s14, 0  ;;  %p55_p3 = scmp.ne.s32.totalorder %s722_s10, %s718_s9 }
   0xc   : > { %s1067_s17 = smov (%p35_p0, %s33_s17), 0  ;;  %p56_p5 = scmp.eq.s32.totalorder %s486_s15, 0 }
   0xd   : > { %p804_p4 = por %p50_p2, %p49_p1  ;;  %s37_s20 = ssub.s32 %s734_s13, %s1067_s17 }
   0xe   : > { %p107_p6 = scmp.eq.s32.totalorder %s486_s15, 1  ;;  %p40_p7 = scmp.eq.s32.totalorder %s37_s20, 0 }
   0xf   : > { %p810_p8 = por %p56_p5, %p55_p3  ;;  %p113_p10 = scmp.eq.s32.totalorder %s487_s16, 1 }
  0x10   : > { %p814_p9 = por %p107_p6, %p49_p1  ;;  %p537_p13 = scmp.lt.s32.totalorder %s738_s14, 2 }
  0x11   : > { %s1051_s21 = scalar_select %p810_p8, 1, 0 }
  0x12   : > { %s1052_s22 = scalar_select %p814_p9, 1, 0 }
  0x13   : > { %s819_s23 = scalar_select %p40_p7, %s726_s11, %s42_s18  }
  0x14   : > { %p821_p11 = por %p113_p10, %p55_p3  ;;  %s828_s25 = sand.u32 1, %s726_s11  }
  0x15   : > { %s490_s26 = sshll.u32 %s828_s25, 6  ;;  %s505_s27 = sshll.u32 %s734_s13, 10 }
  0x16   : > { %s1053_s24 = scalar_select %p821_p11, 1, 0 }
  0x17   : > { %s837_s30 = scalar_lea.hbm %s1045_s0, %s505_s27  ;;  %s137_s3 = scalar_lea.vmem [#allocation2], %s490_s26 }
  0x18   : > { %s146_s4 = sshll.u32 %s137_s3, 4  ;;  %p845_p0 = pnand %p537_p13, %p804_p4  ;;  %s841_s4 = int_to_ptr.vmem [resolvable:$true] %s146_s4 }
  0x19   : > { %s134_s6 = scalar_lea.sflag [#allocation3], %s828_s25  ;;  %s592_s7 = scalar_lea.hbm %s837_s30, 1024 }
  0x1a   : > { %p593_p2 = scmp.ne.s32.totalorder %s837_s30, %s592_s7  ;;  %p594_p3 = pneg %p845_p0 }
  0x1b   : > { %s597_s16 = scalar_lea.hbm %s1045_s0, 2048  ;;  %p598_p4 = scmp.lt.u32.totalorder %s837_s30, %s1045_s0 }
  0x1c   : > { %p595_p5 = pnand %p594_p3, %p593_p2  ;;  %p599_p7 = scmp.lt.u32.totalorder %s597_s16, %s592_s7 }
  0x1d   : > { %p601_p13 = scmp.lt.u32.totalorder %s592_s7, %s837_s30 }
  0x1e   : > { %p596_p6 = pneg %p595_p5  ;;  %p600_p10 = por %p599_p7, %p598_p4 }
  0x20   : > { %p602_p12 = por %p601_p13, %p600_p10 }
  0x22   : > { %p603_p1 = pnand %p602_p12, %p596_p6 }
  0x24   : > { %606 = shalt.err (!%p603_p1)
}
  0x25   : > { %s607_s20 = scalar_lea.vmem %s841_s4, 1024  ;;  %s740_s28 = smov [#allocation2]  }
  0x26   : > { %p608_p2 = scmp.ne.s32.totalorder %s841_s4, %s607_s20  ;;  %s612_s29 = sshll.u32 %s740_s28, 4  ;;  %s613_s29 = int_to_ptr.vmem [resolvable:$false] %s612_s29 }
  0x27   : > { %s614_s3 = scalar_lea.vmem %s613_s29, 2048  ;;  %p615_p9 = scmp.lt.s32.totalorder %s841_s4, %s613_s29 }
  0x28   : > { %p610_p5 = pnand %p608_p2, %p594_p3  ;;  %p616_p4 = scmp.lt.s32.totalorder %s614_s3, %s607_s20 }
  0x2a   : > { %p611_p11 = pneg %p610_p5  ;;  %p617_p7 = por %p616_p4, %p615_p9 }
  0x2c   : > { %p618_p10 = pnand %p617_p7, %p611_p11 }
  0x2e   : > { %621 = shalt.err (!%p618_p10)
}
  0x2f   : > { %s741_s7 = smov 256   ;;  %s742_s8 = smov 16  }
  0x30   : > { %529 = dma.hbm_to_vmem [thread:$0]  (!%p845_p0), %s837_s30, 1024, %s841_s4, %s134_s6, %s741_s7, %s741_s7, %s742_s8  }
  0x31   : > { %p177_p9 = scmp.lt.s32.totalorder %s738_s14, 3  ;;  %s887_s18 = scalar_lea.hbm %s1046_s1, %s505_s27 }
  0x32   : > { %p1055_p11 = scmp.ge.s32.totalorder %s738_s14, 1  ;;  %s160_s20 = scalar_lea.vmem [#allocation5], %s490_s26 }
  0x33   : > { %s169_s28 = sshll.u32 %s160_s20, 4  ;;  %s157_s30 = scalar_lea.sflag [#allocation6], %s828_s25  ;;  %s897_s28 = int_to_ptr.vmem [resolvable:$true] %s169_s28 }
  0x34   : > { %p891_p12 = pnand %p1055_p11, %p177_p9  ;;  %s622_s4 = scalar_lea.hbm %s887_s18, 1024 }
  0x35   : > { %p623_p1 = scmp.ne.s32.totalorder %s887_s18, %s622_s4  ;;  %s627_s29 = scalar_lea.hbm %s1046_s1, 2048 }
  0x36   : > { %p628_p2 = scmp.lt.u32.totalorder %s887_s18, %s1046_s1  ;;  %p629_p5 = scmp.lt.u32.totalorder %s627_s29, %s622_s4 }
  0x37   : > { %p625_p6 = pnand %p623_p1, %p594_p3  ;;  %p631_p7 = scmp.lt.u32.totalorder %s622_s4, %s887_s18 }
  0x38   : > { %p630_p4 = por %p629_p5, %p628_p2 }
  0x39   : > { %p626_p13 = pneg %p625_p6 }
  0x3a   : > { %p632_p10 = por %p631_p7, %p630_p4 }
  0x3c   : > { %p633_p9 = pnand %p632_p10, %p626_p13 }
  0x3e   : > { %636 = shalt.err (!%p633_p9)
}
  0x3f   : > { %s637_s26 = scalar_lea.vmem %s897_s28, 1024  ;;  %s743_s16 = smov [#allocation5]  }
  0x40   : > { %p638_p11 = scmp.ne.s32.totalorder %s897_s28, %s637_s26  ;;  %s642_s20 = sshll.u32 %s743_s16, 4  ;;  %s643_s20 = int_to_ptr.vmem [resolvable:$false] %s642_s20 }
  0x41   : > { %s644_s27 = scalar_lea.vmem %s643_s20, 2048  ;;  %p645_p8 = scmp.lt.s32.totalorder %s897_s28, %s643_s20 }
  0x42   : > { %p640_p1 = pnand %p638_p11, %p594_p3  ;;  %p646_p2 = scmp.lt.s32.totalorder %s644_s27, %s637_s26 }
  0x44   : > { %p641_p6 = pneg %p640_p1  ;;  %p647_p5 = por %p646_p2, %p645_p8 }
  0x46   : > { %p648_p4 = pnand %p647_p5, %p641_p6 }
  0x48   : > { %651 = shalt.err (!%p648_p4)
}
  0x49   : > { %532 = dma.hbm_to_vmem [thread:$0]  (!%p845_p0), %s887_s18, 1024, %s897_s28, %s157_s30, %s741_s7, %s741_s7, %s742_s8  }
  0x4a   : > { %181 = sbr.rel (%p891_p12) target bundleno = 346 (0x15a), region = 28  ;;  %s931_s4 = sand.u32 (!%p891_p12), 1, %s722_s10  }
  0x4b   : > { %s497_s6 = sshll.u32 (!%p891_p12), %s931_s4, 6  ;;  %s184_s29 = scalar_lea.sflag (!%p891_p12), [#allocation3], %s931_s4 }
  0x4c   : > { %s935_s5 = scalar_lea.vmem (!%p891_p12), [#allocation2], %s497_s6  ;;  %p1057_p8 = scmp.ne.s32.totalorder (!%p891_p12), %s1051_s21, 0 }
  0x51   : > { %705 = dma.done.wait (%p1057_p8), %s184_s29, 1024  }
  0x52   : > { %707 = vsyncadd (%p1057_p8), %s184_s29, 4294966272  ;;  %s193_s25 = scalar_lea.sflag [#allocation6], %s931_s4  ;;  %s196_s7 = scalar_lea.vmem [#allocation5], %s497_s6 }
  0x53   : > { %709 = dma.done.wait (%p1057_p8), %s193_s25, 1024  }
  0x54   : > { %711 = vsyncadd (%p1057_p8), %s193_s25, 4294966272  ;;  %s499_s8 = sshll.u32 %s931_s4, 5  ;;  %vm228_vm0 = vcmask 261120   ;;  %v744_v0 = vmov 0.0   ;;  %v242_v1 = vld [vmem:[%s196_s7 + $0x8] sm:$0xff]  ;;  %v244_v2 = vld [vmem:[%s196_s7 + $0x18] sm:$0xff] }
  0x55   : > { %s947_s18 = scalar_lea.vmem [#allocation7], %s499_s8  ;;  %v241_v3 = vld [vmem:[%s196_s7] sm:$0xff]  ;;  %v508_v4 = vpack.c.bf16 %v244_v2, %v242_v1  ;;  %v243_v5 = vld [vmem:[%s196_s7 + $0x10] sm:$0xff]  ;;  %v246_v6 = vld [vmem:[%s196_s7 + $0x28] sm:$0xff]  ;;  %s507_s21 = sshll.u32 %s730_s12, 9 }
  0x56   : > { %229 = vst.msk [vmem:[%s947_s18] sm:$0xff] %vm228_vm0, %v744_v0  ;;  %230 = vst.msk [vmem:[%s947_s18 + $0x8] sm:$0xff] %vm228_vm0, %v744_v0  ;;  %v248_v7 = vld [vmem:[%s196_s7 + $0x38] sm:$0xff]  ;;  %v510_v8 = vpack.c.bf16 %v243_v5, %v241_v3  ;;  %v234_v10 = vld [vmem:[%s935_s5 + $0x8] sm:$0xff]  ;;  %s376_s19 = sshll.u32 %s947_s18, 4  ;;  %s990_s3 = scalar_lea.hbm %s1047_s2, %s507_s21  ;;  %s992_s19 = int_to_ptr.vmem [resolvable:$true] %s376_s19 }
  0x57   : > { %231 = vst.msk [vmem:[%s947_s18 + $0x10] sm:$0xff] %vm228_vm0, %v744_v0  ;;  %232 = vst.msk [vmem:[%s947_s18 + $0x18] sm:$0xff] %vm228_vm0, %v744_v0  ;;  %v512_v9 = vpack.c.bf16 %v248_v7, %v246_v6  ;;  %509 = vmatprep.subr.bf16.mxu0 %v508_v4  ;;  %516 = vmatprep.subr.bf16.mxu1 %v508_v4  ;;  %v238_v11 = vld [vmem:[%s935_s5 + $0x28] sm:$0xff]  ;;  %v245_v12 = vld [vmem:[%s196_s7 + $0x20] sm:$0xff]  ;;  %s363_s12 = scalar_lea.sflag [#allocation4], %s931_s4  ;;  %s652_s15 = scalar_lea.vmem %s992_s19, 512 }
  0x58   : > { %511 = vmatpush1.bf16.xpose.msra.mxu0 %v510_v8  ;;  %518 = vmatpush1.bf16.xpose.msra.mxu1 %v510_v8  ;;  %v247_v13 = vld [vmem:[%s196_s7 + $0x30] sm:$0xff]  ;;  %v233_v15 = vld [vmem:[%s935_s5] sm:$0xff]  ;;  %v236_v17 = vld [vmem:[%s935_s5 + $0x18] sm:$0xff]  ;;  %p653_p0 = scmp.ne.s32.totalorder %s992_s19, %s652_s15  ;;  %p1058_p3 = scmp.ne.s32.totalorder %s1052_s22, 0 }
  0x59   : > { %513 = vmatprep.subr.bf16.mxu0 %v512_v9  ;;  %517 = vmatprep.subr.bf16.mxu1 %v512_v9  ;;  %v514_v14 = vpack.c.bf16 %v247_v13, %v245_v12  ;;  %v237_v16 = vld [vmem:[%s935_s5 + $0x20] sm:$0xff]  ;;  %v240_v18 = vld [vmem:[%s935_s5 + $0x38] sm:$0xff]  ;;  %v235_v19 = vld [vmem:[%s935_s5 + $0x10] sm:$0xff]  ;;  %s745_s26 = smov [#allocation7]  }
  0x5a   : > { %317 = vmatprep.mubr.f32.mxu0 %v234_v10  ;;  %327 = vmatprep.mubr.f32.mxu1 %v238_v11  ;;  %v239_v20 = vld [vmem:[%s935_s5 + $0x30] sm:$0xff]  ;;  %p654_p12 = pnand %p653_p0, %p1058_p3  ;;  %s656_s16 = sshll.u32 %s745_s26, 4  ;;  %s657_s16 = int_to_ptr.vmem [resolvable:$false] %s656_s16 }
  0x5b   : > { %s658_s20 = scalar_lea.vmem %s657_s16, 1024  ;;  %p659_p7 = scmp.lt.s32.totalorder %s992_s19, %s657_s16 }
  0x5c   : > { %p655_p13 = pneg %p654_p12  ;;  %p660_p10 = scmp.lt.s32.totalorder %s658_s20, %s652_s15 }
  0x5d   : > { %v249_v21 = vld [vmem:[%s947_s18] sm:$0xff]  ;;  %v250_v29 = vld [vmem:[%s947_s18 + $0x8] sm:$0xff] }
  0x5e   : > { %v251_v22 = vld [vmem:[%s947_s18 + $0x10] sm:$0xff]  ;;  %v252_v30 = vld [vmem:[%s947_s18 + $0x18] sm:$0xff]  ;;  %p661_p9 = por %p660_p10, %p659_p7 }
  0x60   : > { %515 = vmatpush1.bf16.xpose.msra.mxu0 %v514_v14  ;;  %519 = vmatpush1.bf16.xpose.msra.mxu1 %v514_v14  ;;  %p662_p11 = pnand %p661_p9, %p655_p13 }
  0x67   : > { %318 = vmatmul.mubr.f32.vlgmr.msra.gmra.mrb[0].mxu0 %v233_v15  ;;  %328 = vmatmul.mubr.f32.vlgmr.msra.gmra.mrb[0].mxu1 %v237_v16 }
  0x68   : > { %322 = vmatprep.mubr.f32.mxu0 %v236_v17  ;;  %332 = vmatprep.mubr.f32.mxu1 %v240_v18 }
  0x6b   : > { %323 = vmatmul.mubr.f32.gmra.mrb[2].mxu0 %v235_v19  ;;  %333 = vmatmul.mubr.f32.gmra.mrb[2].mxu1 %v239_v20 }
 0x13a   : > { %v319_v23 = vpop.f32.mrb[0].mxu0  ;;  %v329_v24 = vpop.f32.mrb[0].mxu1 }
 0x13b   : > { %v338_v25 = vadd.f32 %v319_v23, %v249_v21  ;;  %v340_v26 = vadd.f32 %v329_v24, %v251_v22  ;;  %v321_v27 = vpop.f32.mrb[1].mxu0  ;;  %v331_v28 = vpop.f32.mrb[1].mxu1 }
 0x13d   : > { %343 = vst.msk [vmem:[%s947_s18] sm:$0xff] %vm228_vm0, %v338_v25  ;;  %345 = vst.msk [vmem:[%s947_s18 + $0x10] sm:$0xff] %vm228_vm0, %v340_v26 }
 0x13e   : > { %v324_v31 = vpop.f32.mrb[2].mxu0  ;;  %v334_v32 = vpop.f32.mrb[2].mxu1 }
 0x13f   : > { %v339_v33 = vadd.f32 %v324_v31, %v250_v29  ;;  %v341_v34 = vadd.f32 %v334_v32, %v252_v30  ;;  %v326_v35 = vpop.f32.mrb[3].mxu0  ;;  %v336_v36 = vpop.f32.mrb[3].mxu1 }
 0x141   : > { %344 = vst.msk [vmem:[%s947_s18 + $0x8] sm:$0xff] %vm228_vm0, %v339_v33  ;;  %346 = vst.msk [vmem:[%s947_s18 + $0x18] sm:$0xff] %vm228_vm0, %v341_v34 }
 0x144   : > { %v350_v37 = vld [vmem:[%s947_s18] sm:$0xff]  ;;  %v352_v38 = vld [vmem:[%s947_s18 + $0x10] sm:$0xff] }
 0x145   : > { %v354_v39 = vmul.f32 0.17677669, %v350_v37  ;;  %v356_v40 = vmul.f32 0.17677669, %v352_v38 }
 0x147   : > { %358 = vst.msk [vmem:[%s947_s18] sm:$0xff] %vm228_vm0, %v354_v39  ;;  %360 = vst.msk [vmem:[%s947_s18 + $0x10] sm:$0xff] %vm228_vm0, %v356_v40 }
 0x148   : > { %v351_v41 = vld [vmem:[%s947_s18 + $0x8] sm:$0xff]  ;;  %v353_v42 = vld [vmem:[%s947_s18 + $0x18] sm:$0xff] }
 0x149   : > { %v355_v43 = vmul.f32 0.17677669, %v351_v41  ;;  %v357_v44 = vmul.f32 0.17677669, %v353_v42 }
 0x14b   : > { %359 = vst.msk [vmem:[%s947_s18 + $0x8] sm:$0xff] %vm228_vm0, %v355_v43  ;;  %361 = vst.msk [vmem:[%s947_s18 + $0x18] sm:$0xff] %vm228_vm0, %v357_v44 }
 0x14c   : > { %665 = shalt.err (!%p662_p11)
}
 0x14d   : > { %s666_s27 = scalar_lea.hbm %s990_s3, 512  ;;  %s670_s5 = scalar_lea.hbm %s1047_s2, 1024 }
 0x14e   : > { %p667_p1 = scmp.ne.s32.totalorder %s990_s3, %s666_s27  ;;  %p671_p5 = scmp.lt.u32.totalorder %s990_s3, %s1047_s2 }
 0x14f   : > { %p672_p4 = scmp.lt.u32.totalorder %s670_s5, %s666_s27  ;;  %p674_p0 = scmp.lt.u32.totalorder %s666_s27, %s990_s3 }
 0x150   : > { %p668_p6 = pnand %p667_p1, %p1058_p3 }
 0x151   : > { %p673_p8 = por %p672_p4, %p671_p5 }
 0x152   : > { %p669_p2 = pneg %p668_p6 }
 0x153   : > { %p675_p12 = por %p674_p0, %p673_p8 }
 0x155   : > { %p676_p13 = pnand %p675_p12, %p669_p2 }
 0x157   : > { %679 = shalt.err (!%p676_p13)
}
 0x158   : > { %s746_s8 = smov 128   ;;  %s747_s18 = smov 8  }
 0x159   : > { %524 = dma.vmem_to_hbm [thread:$0]  (%p1058_p3), %s992_s19, 512, %s990_s3, %s363_s12, %s746_s8, %s746_s8, %s747_s18  }
 0x15a PF: > { %s391_s21 = sand.u32 1, %s718_s9   ;;  %p1059_p7 = scmp.ne.s32.totalorder %s1053_s24, 0 }
 0x15b   : > { %p1060_p10 = scmp.ge.s32.totalorder %s738_s14, 2  ;;  %s392_s28 = scalar_lea.sflag [#allocation4], %s391_s21 }
 0x15d   : > { %p534_p9 = pnand %p1060_p10, %p1059_p7 }
 0x15f   : > { %713 = dma.done.wait (!%p534_p9), %s392_s28, 512  }
 0x160   : > { %715 = vsyncadd (!%p534_p9), %s392_s28, 4294966784  ;;  %s21_s14 = sadd.s32 1, %s738_s14   ;;  %s1061_s9 = smov %s722_s10 }
 0x161   : > { %p18_p11 = scmp.ge.s32.totalorder %s21_s14, 4   ;;  %s1062_s10 = smov %s726_s11 }
 0x162   : > { %s1063_s11 = smov %s819_s23  ;;  %s1064_s12 = smov %s734_s13 }
 0x163   : > { %s1065_s13 = smov %s1067_s17  ;;  %20 = sbr.rel (!%p18_p11) target bundleno = 8 (0x8), region = 94 }
 0x16a   :  { %397 = vsyncpa [#allocation3], 1 }
 0x16b   :  { %399 = vsyncpa [#allocation3 + $0x1], 1 }
 0x16c   :  { %400 = vsyncpa [#allocation6], 1 }
 0x16d   :  { %402 = vsyncpa [#allocation6 + $0x1], 1 }
 0x16e   :  { %403 = vsyncpa [#allocation4], 1 }
 0x16f   :  { %405 = vsyncpa [#allocation4 + $0x1], 1 }

</bundles_post_ra>
